<compile_context>
chip_gen: v6e
topology: v6e:2x2x1
jax: 0.10.0
libtpu: 0.0.40
codegen_flags: <defaults>
</compile_context>

<pallas_src>
import jax
import jax.numpy as jnp
from jax.experimental import pallas as pl
from jax.experimental.pallas import tpu as pltpu


def actor_kernel(x_ref, w1_ref, b12_ref, w2_ref, w3_ref, b3b_ref, o_ref):
    # Layer 1: Linear (MXU, f32 accumulate) + bias + ReLU (all elementwise in f32)
    h1 = jnp.dot(x_ref[...], w1_ref[...], preferred_element_type=jnp.float32)
    h1 = jnp.maximum(h1 + b12_ref[0:1, :], 0.0)
    # Layer 2: cast only the dot input down to the weight dtype (bf16 path);
    # bias add / ReLU stay f32.
    h2 = jnp.dot(h1.astype(w2_ref.dtype), w2_ref[...],
                 preferred_element_type=jnp.float32)
    h2 = jnp.maximum(h2 + b12_ref[1:2, :], 0.0)
    # Layer 3: Linear + Tanh, then scale by action_bound (f32).
    h3 = jnp.dot(h2.astype(w3_ref.dtype), w3_ref[...],
                 preferred_element_type=jnp.float32)
    out = jnp.tanh(h3 + b3b_ref[0:1, :]) * b3b_ref[1:2, :]
    o_ref[...] = out.astype(o_ref.dtype)


def _choose_batch_tile(B):
    """Largest power-of-two tile <= 1024 dividing B that still leaves >= 2 grid
    steps (keeps both v7x TensorCores busy and enables pipelining)."""
    for t in (1024, 512, 256, 128, 64, 32, 16, 8):
        if B % t == 0 and t <= B // 2:
            return t
    return B  # tiny batches: single step, full batch


def actor_forward(state, params, action_bound, *, batch_tile=None, use_bf16=True):
    """Run the Actor MLP. state: (B, state_dim) f32. Returns (B, action_dim) f32."""
    w1, b1, w2, b2, w3, b3 = params
    b1 = jnp.reshape(b1, (1, -1))
    b2 = jnp.reshape(b2, (1, -1))
    b3 = jnp.reshape(b3, (1, -1))

    B, state_dim = state.shape
    fc = w1.shape[1]
    action_dim = w3.shape[1]

    # --- Lane-dense hidden width: zero-pad fc up to a multiple of 128 (exact). ---
    fc_pad = max(128, ((fc + 127) // 128) * 128)
    if fc_pad != fc:
        pad = fc_pad - fc
        w1 = jnp.pad(w1, ((0, 0), (0, pad)))
        b1 = jnp.pad(b1, ((0, 0), (0, pad)))
        w2 = jnp.pad(w2, ((0, pad), (0, pad)))
        b2 = jnp.pad(b2, ((0, 0), (0, pad)))
        w3 = jnp.pad(w3, ((0, pad), (0, 0)))

    # --- Collapse tiny broadcast operands into two arrays. ---
    b12 = jnp.concatenate([b1, b2], axis=0).astype(jnp.float32)            # (2, fc_pad)
    bound = jnp.broadcast_to(jnp.asarray(action_bound, jnp.float32),
                             (1, action_dim))
    b3b = jnp.concatenate([b3.astype(jnp.float32), bound], axis=0)         # (2, action_dim)

    # --- bf16 MXU inputs, f32 accumulation (numerics stay f32 elementwise). ---
    mxu_dtype = jnp.bfloat16 if use_bf16 else jnp.float32
    x = state.astype(mxu_dtype)
    w1 = w1.astype(mxu_dtype)
    w2 = w2.astype(mxu_dtype)
    w3 = w3.astype(mxu_dtype)

    # --- Batch tiling. ---
    if batch_tile is None:
        batch_tile = _choose_batch_tile(B)
    assert B % batch_tile == 0, "batch_tile must divide B"
    assert batch_tile % 8 == 0 or batch_tile == B, \
        "batch_tile must be a multiple of 8 (or equal to B)"
    grid = (B // batch_tile,)

    in_specs = [
        pl.BlockSpec((batch_tile, state_dim), lambda i: (i, 0)),   # x (streamed)
        pl.BlockSpec((state_dim, fc_pad), lambda i: (0, 0)),       # w1 (resident)
        pl.BlockSpec((2, fc_pad), lambda i: (0, 0)),               # b1 / b2
        pl.BlockSpec((fc_pad, fc_pad), lambda i: (0, 0)),          # w2
        pl.BlockSpec((fc_pad, action_dim), lambda i: (0, 0)),      # w3
        pl.BlockSpec((2, action_dim), lambda i: (0, 0)),           # b3 / action_bound
    ]
    out_spec = pl.BlockSpec((batch_tile, action_dim), lambda i: (i, 0))

    # Advisory cost estimate so XLA can schedule/overlap the custom call.
    flops = 2 * B * (state_dim * fc_pad + fc_pad * fc_pad + fc_pad * action_dim)
    weight_bytes = ((w1.size + w2.size + w3.size) * w1.dtype.itemsize
                    + (b12.size + b3b.size) * 4)
    bytes_accessed = int(x.size * x.dtype.itemsize + weight_bytes
                         + B * action_dim * 4)
    cost = pl.CostEstimate(flops=int(flops),
                           transcendentals=int(B * action_dim),
                           bytes_accessed=bytes_accessed)

    return pl.pallas_call(
        actor_kernel,
        out_shape=jax.ShapeDtypeStruct((B, action_dim), jnp.float32),
        grid_spec=pltpu.PrefetchScalarGridSpec(
            num_scalar_prefetch=0,
            grid=grid,
            in_specs=in_specs,
            out_specs=out_spec,
        ),
        compiler_params=pltpu.CompilerParams(
            dimension_semantics=("parallel",)),
        cost_estimate=cost,
    )(x, w1, b12, w2, w3, b3b)


def init_actor_params(key, state_dim, action_dim, fc_units=64):
    """Deterministic init mimicking PyTorch Linear default U(-1/sqrt(in), 1/sqrt(in))."""
    def linear_init(k, fan_in, fan_out):
        kw, kb = jax.random.split(k)
        bound = 1.0 / jnp.sqrt(fan_in)
        w = jax.random.uniform(kw, (fan_in, fan_out), jnp.float32, -bound, bound)
        b = jax.random.uniform(kb, (1, fan_out), jnp.float32, -bound, bound)
        return w, b

    k1, k2, k3 = jax.random.split(key, 3)
    w1, b1 = linear_init(k1, state_dim, fc_units)
    w2, b2 = linear_init(k2, fc_units, fc_units)
    w3, b3 = linear_init(k3, fc_units, action_dim)
    return (w1, b1, w2, b2, w3, b3)


def actor_reference(state, params, action_bound, *, mxu_dtype=jnp.float32):
    """Pure-JAX reference; mxu_dtype=bfloat16 mirrors the kernel's cast points."""
    w1, b1, w2, b2, w3, b3 = params
    x = state.astype(mxu_dtype)
    h = jnp.dot(x, w1.astype(mxu_dtype), preferred_element_type=jnp.float32) + b1
    h = jnp.maximum(h, 0.0)
    h = jnp.dot(h.astype(mxu_dtype), w2.astype(mxu_dtype),
                preferred_element_type=jnp.float32) + b2
    h = jnp.maximum(h, 0.0)
    h = jnp.dot(h.astype(mxu_dtype), w3.astype(mxu_dtype),
                preferred_element_type=jnp.float32) + b3
    return jnp.tanh(h) * action_bound


if __name__ == "__main__":
    key = jax.random.PRNGKey(0)
    k_state, k_params, k_bound = jax.random.split(key, 3)

    B = 64            # small batch; _choose_batch_tile -> tile=32, grid=(2,)
    state_dim = 16
    action_dim = 8
    fc_units = 64

    state = jax.random.normal(k_state, (B, state_dim), jnp.float32)
    params = init_actor_params(k_params, state_dim, action_dim, fc_units)
    # action_bound: per-action positive bound (broadcasts like the torch tensor)
    action_bound = jax.random.uniform(k_bound, (1, action_dim), jnp.float32, 0.5, 2.0)

    # bf16-MXU path (default)
    out = actor_forward(state, params, action_bound)
    out = jax.block_until_ready(out)
    assert out.shape == (B, action_dim)

    ref_bf16 = actor_reference(state, params, action_bound, mxu_dtype=jnp.bfloat16)
    ref_f32 = actor_reference(state, params, action_bound, mxu_dtype=jnp.float32)
    assert jnp.allclose(out, ref_bf16, atol=5e-3, rtol=5e-3), "mismatch vs matched bf16 reference"
    assert jnp.allclose(out, ref_f32, atol=5e-2, rtol=5e-2), "mismatch vs f32 reference"

    # Pure-f32 path (exact vs the f32 reference)
    out_f32 = jax.block_until_ready(
        actor_forward(state, params, action_bound, use_bf16=False))
    assert jnp.allclose(out_f32, ref_f32, atol=1e-5, rtol=1e-5), "f32 path mismatch"

    print("KERNEL_OK")
</pallas_src>

<mosaic_0001>
module attributes {stable_mosaic.version = 11 : i64} {
  func.func @actor_kernel(%arg0: i32, %arg1: memref<32x16xbf16, #tpu.memory_space<vmem>>, %arg2: memref<16x128xbf16, #tpu.memory_space<vmem>>, %arg3: memref<2x128xf32, #tpu.memory_space<vmem>>, %arg4: memref<128x128xbf16, #tpu.memory_space<vmem>>, %arg5: memref<128x8xbf16, #tpu.memory_space<vmem>>, %arg6: memref<2x8xf32, #tpu.memory_space<vmem>>, %arg7: memref<32x8xf32, #tpu.memory_space<vmem>>) attributes {dimension_semantics = [#tpu.dimension_semantics<parallel>], iteration_bounds = array<i64: 2>, scalar_prefetch = 0 : i64, scratch_operands = 0 : i64, tpu.core_type = #tpu.core_type<tc>, window_params = [{transform_indices = @transform_0, window_bounds = array<i64: 32, 16>}, {pipeline_mode = #tpu.pipeline_mode<synchronous>, transform_indices = @transform_1, window_bounds = array<i64: 16, 128>}, {pipeline_mode = #tpu.pipeline_mode<synchronous>, transform_indices = @transform_2, window_bounds = array<i64: 2, 128>}, {pipeline_mode = #tpu.pipeline_mode<synchronous>, transform_indices = @transform_3, window_bounds = array<i64: 128, 128>}, {pipeline_mode = #tpu.pipeline_mode<synchronous>, transform_indices = @transform_4, window_bounds = array<i64: 128, 8>}, {pipeline_mode = #tpu.pipeline_mode<synchronous>, transform_indices = @transform_5, window_bounds = array<i64: 2, 8>}, {transform_indices = @transform_6, window_bounds = array<i64: 32, 8>}]} {
    %c0 = arith.constant 0 : index
    %c0_0 = arith.constant 0 : index
    %0 = vector.load %arg1[%c0, %c0_0] : memref<32x16xbf16, #tpu.memory_space<vmem>>, vector<32x16xbf16>
    %c0_1 = arith.constant 0 : index
    %c0_2 = arith.constant 0 : index
    %1 = vector.load %arg2[%c0_1, %c0_2] : memref<16x128xbf16, #tpu.memory_space<vmem>>, vector<16x128xbf16>
    %cst = arith.constant dense<0.000000e+00> : vector<32x128xf32>
    %2 = tpu.matmul %0, %1, %cst {dimension_numbers = #tpu.dot_dimension_numbers<[1], [0], [0], [1], [0, 0, 1, 1], [], []>} : vector<32x16xbf16>, vector<16x128xbf16>, vector<32x128xf32> -> vector<32x128xf32>
    %c0_3 = arith.constant 0 : index
    %c0_4 = arith.constant 0 : index
    %3 = vector.load %arg3[%c0_3, %c0_4] : memref<2x128xf32, #tpu.memory_space<vmem>>, vector<1x128xf32>
    %4 = vector.broadcast %3 : vector<1x128xf32> to vector<32x128xf32>
    %5 = arith.addf %2, %4 : vector<32x128xf32>
    %cst_5 = arith.constant 0.000000e+00 : f32
    %6 = vector.broadcast %cst_5 : f32 to vector<32x128xf32>
    %7 = arith.maximumf %5, %6 : vector<32x128xf32>
    %8 = arith.truncf %7 : vector<32x128xf32> to vector<32x128xbf16>
    %c0_6 = arith.constant 0 : index
    %c0_7 = arith.constant 0 : index
    %9 = vector.load %arg4[%c0_6, %c0_7] : memref<128x128xbf16, #tpu.memory_space<vmem>>, vector<128x128xbf16>
    %cst_8 = arith.constant dense<0.000000e+00> : vector<32x128xf32>
    %10 = tpu.matmul %8, %9, %cst_8 {dimension_numbers = #tpu.dot_dimension_numbers<[1], [0], [0], [1], [0, 0, 1, 1], [], []>} : vector<32x128xbf16>, vector<128x128xbf16>, vector<32x128xf32> -> vector<32x128xf32>
    %c1 = arith.constant 1 : index
    %c0_9 = arith.constant 0 : index
    %11 = vector.load %arg3[%c1, %c0_9] : memref<2x128xf32, #tpu.memory_space<vmem>>, vector<1x128xf32>
    %12 = vector.broadcast %11 : vector<1x128xf32> to vector<32x128xf32>
    %13 = arith.addf %10, %12 : vector<32x128xf32>
    %cst_10 = arith.constant 0.000000e+00 : f32
    %14 = vector.broadcast %cst_10 : f32 to vector<32x128xf32>
    %15 = arith.maximumf %13, %14 : vector<32x128xf32>
    %16 = arith.truncf %15 : vector<32x128xf32> to vector<32x128xbf16>
    %c0_11 = arith.constant 0 : index
    %c0_12 = arith.constant 0 : index
    %17 = vector.load %arg5[%c0_11, %c0_12] : memref<128x8xbf16, #tpu.memory_space<vmem>>, vector<128x8xbf16>
    %cst_13 = arith.constant dense<0.000000e+00> : vector<32x8xf32>
    %18 = tpu.matmul %16, %17, %cst_13 {dimension_numbers = #tpu.dot_dimension_numbers<[1], [0], [0], [1], [0, 0, 1, 1], [], []>} : vector<32x128xbf16>, vector<128x8xbf16>, vector<32x8xf32> -> vector<32x8xf32>
    %c0_14 = arith.constant 0 : index
    %c0_15 = arith.constant 0 : index
    %19 = vector.load %arg6[%c0_14, %c0_15] : memref<2x8xf32, #tpu.memory_space<vmem>>, vector<1x8xf32>
    %20 = vector.broadcast %19 : vector<1x8xf32> to vector<32x8xf32>
    %21 = arith.addf %18, %20 : vector<32x8xf32>
    %22 = math.tanh %21 : vector<32x8xf32>
    %c1_16 = arith.constant 1 : index
    %c0_17 = arith.constant 0 : index
    %23 = vector.load %arg6[%c1_16, %c0_17] : memref<2x8xf32, #tpu.memory_space<vmem>>, vector<1x8xf32>
    %24 = vector.broadcast %23 : vector<1x8xf32> to vector<32x8xf32>
    %25 = arith.mulf %22, %24 : vector<32x8xf32>
    %c0_18 = arith.constant 0 : index
    %c0_19 = arith.constant 0 : index
    %26 = vector.load %arg7[%c0_18, %c0_19] : memref<32x8xf32, #tpu.memory_space<vmem>>, vector<32x8xf32>
    tpu.vector_store %arg7[%c0_18, %c0_19], %25 {strides = array<i32>} : memref<32x8xf32, #tpu.memory_space<vmem>>, vector<32x8xf32>,
    return
  }
  func.func @transform_0(%arg0: i32) -> (i32, i32) {
    %c0_i32 = arith.constant 0 : i32
    %c0_i32_0 = arith.constant 0 : i32
    return %arg0, %c0_i32 : i32, i32
  }
  func.func @transform_1(%arg0: i32) -> (i32, i32) {
    %c0_i32 = arith.constant 0 : i32
    %c0_i32_0 = arith.constant 0 : i32
    %c0_i32_1 = arith.constant 0 : i32
    return %c0_i32, %c0_i32_0 : i32, i32
  }
  func.func @transform_2(%arg0: i32) -> (i32, i32) {
    %c0_i32 = arith.constant 0 : i32
    %c0_i32_0 = arith.constant 0 : i32
    %c0_i32_1 = arith.constant 0 : i32
    return %c0_i32, %c0_i32_0 : i32, i32
  }
  func.func @transform_3(%arg0: i32) -> (i32, i32) {
    %c0_i32 = arith.constant 0 : i32
    %c0_i32_0 = arith.constant 0 : i32
    %c0_i32_1 = arith.constant 0 : i32
    return %c0_i32, %c0_i32_0 : i32, i32
  }
  func.func @transform_4(%arg0: i32) -> (i32, i32) {
    %c0_i32 = arith.constant 0 : i32
    %c0_i32_0 = arith.constant 0 : i32
    %c0_i32_1 = arith.constant 0 : i32
    return %c0_i32, %c0_i32_0 : i32, i32
  }
  func.func @transform_5(%arg0: i32) -> (i32, i32) {
    %c0_i32 = arith.constant 0 : i32
    %c0_i32_0 = arith.constant 0 : i32
    %c0_i32_1 = arith.constant 0 : i32
    return %c0_i32, %c0_i32_0 : i32, i32
  }
  func.func @transform_6(%arg0: i32) -> (i32, i32) {
    %c0_i32 = arith.constant 0 : i32
    %c0_i32_0 = arith.constant 0 : i32
    return %arg0, %c0_i32 : i32, i32
  }
}

</mosaic_0001>

<bundles_post_ra>
// kernel: tpu_custom_call.1
= control target key start
LH: loop header
LB: loop body
LE: loop exit
PB: predicated region body
PF: predicated region fallthrough
CT: control target
= control target key end

     0   :  { %s844_s21 = smov 0   ;;  %s928_s0 = inlined_call_operand.vmem [shape: bf16[64,16], index: 0, kind: input, shape index: {}]   ;;  %s929_s1 = inlined_call_operand.vmem [shape: bf16[16,128], index: 1, kind: input, shape index: {}]   ;;  %s930_s2 = inlined_call_operand.vmem [shape: f32[2,128], index: 2, kind: input, shape index: {}]   ;;  %s931_s3 = inlined_call_operand.vmem [shape: bf16[128,128], index: 3, kind: input, shape index: {}]   ;;  %s932_s4 = inlined_call_operand.vmem [shape: bf16[128,8], index: 4, kind: input, shape index: {}]   ;;  %s933_s5 = inlined_call_operand.vmem [shape: f32[2,8], index: 5, kind: input, shape index: {}]   ;;  %s934_s6 = inlined_call_operand.vmem [shape: f32[64,8], index: 6, kind: output, shape index: {}]  }
   0x1 LB: > { %s661_s22 = sadd.s32 4294967295, %s807_s21   ;;  %p665_p0 = scmp.ge.s32.totalorder %s807_s21, 1  ;;  %s807_s21 = sphi %s844_s21, %s16_s21  }
   0x2   : > { %p213_p1 = scmp.lt.s32.totalorder %s807_s21, 3 }
   0x4   : > { %p214_p2 = pnand %p665_p0, %p213_p1 }
   0x5   : > { %s666_s25 = sshll.u32 (!%p214_p2), %s661_s22, 2 }
   0x6   : > { %217 = sbr.rel (%p214_p2) target bundleno = 646 (0x286), region = 44  ;;  %p244_p3 = scmp.lt.s32.totalorder (!%p214_p2), %s666_s25, 7 }
   0xb   : > { %v774_v0 = vld [vmem:[%s929_s1] sm:$0xff]   ;;  %v777_v1 = vld [vmem:[%s931_s3 + $0x38] sm:$0xff]   ;;  %s936_s25 = smov (!%p244_p3, %s666_s25), 7  ;;  %v778_v2 = vld [vmem:[%s931_s3 + $0x30] sm:$0xff]   ;;  %vm283_vm0 = vcmask 130048   ;;  %vm600_vm1 = vcmask 64512  }
   0xc   : > { %720 = vmatprep.subr.bf16.mxu0 %v774_v0  ;;  %726 = vmatprep.subr.bf16.mxu1 %v777_v1  ;;  %s667_s30 = sshll.u32 %s936_s25, 2  ;;  %v779_v3 = vld [vmem:[%s931_s3 + $0x28] sm:$0xff]   ;;  %v780_v6 = vld [vmem:[%s931_s3 + $0x20] sm:$0xff]   ;;  %v781_v7 = vld [vmem:[%s931_s3 + $0x18] sm:$0xff]   ;;  %s669_s23 = sshll.u32 %s936_s25, 3 }
   0xd   : > { %721 = vmatpush3.bf16.msra.mxu0 %v774_v0  ;;  %727 = vmatpush3.bf16.msra.mxu1 %v777_v1  ;;  %s247_s11 = scalar_lea.vmem %s928_s0, %s667_s30  ;;  %v782_v8 = vld [vmem:[%s931_s3 + $0x10] sm:$0xff]   ;;  %v783_v9 = vld [vmem:[%s931_s3 + $0x8] sm:$0xff]   ;;  %v784_v10 = vld [vmem:[%s931_s3] sm:$0xff]   ;;  %s253_s27 = scalar_lea.vmem %s934_s6, %s669_s23 }
   0xe   : > { %728 = vmatprep.subr.bf16.mxu1 %v778_v2  ;;  %v775_v4 = vld [vmem:[%s247_s11] sm:$0xff]   ;;  %v776_v5 = vld [vmem:[%s247_s11 + $0x8] sm:$0xff]   ;;  %v785_v11 = vld [vmem:[%s932_s4 + $0x38] sm:$0xff]  }
   0xf   : > { %722 = vmatprep.mubr.msk.bf16.mxu0 %vm283_vm0, %v775_v4  ;;  %v786_v12 = vld [vmem:[%s932_s4 + $0x30] sm:$0xff]   ;;  %746 = vmatprep.subr.bf16.mxu0 %v785_v11  ;;  %v787_v13 = vld [vmem:[%s932_s4 + $0x28] sm:$0xff]   ;;  %v788_v14 = vld [vmem:[%s932_s4 + $0x20] sm:$0xff]  }
  0x10   : > { %723 = vmatmul.mubr.msk.bf16.vlgmr.msra.gmra.mxu0 %vm283_vm0, %v776_v5  ;;  %v789_v15 = vld [vmem:[%s932_s4 + $0x18] sm:$0xff]   ;;  %v670_v18 = vld [vmem:[%s930_s2] ss:$0 sm:$0xff]  ;;  %v790_v31 = vld [vmem:[%s932_s4 + $0x10] sm:$0xff]  }
  0x11   : > { %729 = vmatpush3.bf16.msra.mxu1 %v778_v2  ;;  %747 = vmatpush3.bf16.msra.mxu0 %v785_v11  ;;  %v791_v32 = vld [vmem:[%s932_s4 + $0x8] sm:$0xff]   ;;  %v792_v33 = vld [vmem:[%s932_s4] sm:$0xff]  }
  0x12   : > { %730 = vmatprep.subr.bf16.mxu1 %v779_v3  ;;  %748 = vmatprep.subr.bf16.mxu0 %v786_v12  ;;  %v676_v36 = vld [vmem:[%s930_s2 + $0x1] ss:$0 sm:$0xff]  ;;  %v685_v50 = vld [vmem:[%s933_s5] ss:$0 sm:$0xff] }
  0x13   : > { %v694_v59 = vld [vmem:[%s933_s5 + $0x1] ss:$0 sm:$0xff] }
  0x15   : > { %731 = vmatpush3.bf16.msra.mxu1 %v779_v3  ;;  %749 = vmatpush3.bf16.msra.mxu0 %v786_v12 }
  0x16   : > { %732 = vmatprep.subr.bf16.mxu1 %v780_v6  ;;  %750 = vmatprep.subr.bf16.mxu0 %v787_v13 }
  0x19   : > { %733 = vmatpush3.bf16.msra.mxu1 %v780_v6  ;;  %751 = vmatpush3.bf16.msra.mxu0 %v787_v13 }
  0x1a   : > { %734 = vmatprep.subr.bf16.mxu1 %v781_v7  ;;  %752 = vmatprep.subr.bf16.mxu0 %v788_v14 }
  0x1d   : > { %735 = vmatpush3.bf16.msra.mxu1 %v781_v7  ;;  %753 = vmatpush3.bf16.msra.mxu0 %v788_v14 }
  0x1e   : > { %736 = vmatprep.subr.bf16.mxu1 %v782_v8  ;;  %754 = vmatprep.subr.bf16.mxu0 %v789_v15 }
  0x21   : > { %737 = vmatpush3.bf16.msra.mxu1 %v782_v8  ;;  %755 = vmatpush3.bf16.msra.mxu0 %v789_v15 }
  0x22   : > { %738 = vmatprep.subr.bf16.mxu1 %v783_v9  ;;  %756 = vmatprep.subr.bf16.mxu0 %v790_v31 }
  0x25   : > { %739 = vmatpush3.bf16.msra.mxu1 %v783_v9  ;;  %757 = vmatpush3.bf16.msra.mxu0 %v790_v31 }
  0x26   : > { %740 = vmatprep.subr.bf16.mxu1 %v784_v10  ;;  %758 = vmatprep.subr.bf16.mxu0 %v791_v32 }
  0x29   : > { %741 = vmatpush3.bf16.msra.mxu1 %v784_v10  ;;  %759 = vmatpush3.bf16.msra.mxu0 %v791_v32 }
  0x2a   : > { %760 = vmatprep.subr.bf16.mxu0 %v792_v33 }
  0x2d   : > { %761 = vmatpush3.bf16.msra.mxu0 %v792_v33 }
  0xd0   : > { %v724_v16 = vpop.f32.mrf.mxu0 }
  0xd1   : > { %v333_v22 = vadd.f32 %v724_v16, %v670_v18 }
  0xd2   : > { %v324_v17 = vpop.f32.mrf.mxu0 }
  0xd3   : > { %v325_v20 = vadd.f32 %v670_v18, %v324_v17  ;;  %v341_v28 = vmax.f32 %v333_v22, 0.0 }
  0xd4   : > { %v725_v19 = vpop.f32.mrf.mxu0 }
  0xd5   : > { %v336_v21 = vadd.f32 %v725_v19, %v670_v18  ;;  %v339_v26 = vmax.f32 %v325_v20, 0.0 }
  0xd6   : > { %v327_v23 = vpop.f32.mrf.mxu0 }
  0xd7   : > { %v328_v24 = vadd.f32 %v670_v18, %v327_v23  ;;  %v342_v25 = vmax.f32 %v336_v21, 0.0 }
  0xd9   : > { %v340_v27 = vmax.f32 %v328_v24, 0.0  ;;  %v344_v30 = vpack.c.bf16 %v342_v25, %v341_v28 }
  0xdb   : > { %v343_v29 = vpack.c.bf16 %v340_v27, %v339_v26 }
  0xdd   : > { %742 = vmatprep.mubr.bf16.mxu1 %v343_v29 }
  0xde   : > { %743 = vmatmul.mubr.bf16.vlgmr.msra.gmra.mxu1 %v344_v30 }
 0x19e   : > { %v744_v34 = vpop.f32.mrf.mxu1 }
 0x19f   : > { %v457_v40 = vadd.f32 %v744_v34, %v676_v36 }
 0x1a0   : > { %v448_v35 = vpop.f32.mrf.mxu1 }
 0x1a1   : > { %v449_v38 = vadd.f32 %v676_v36, %v448_v35  ;;  %v465_v46 = vmax.f32 %v457_v40, 0.0 }
 0x1a2   : > { %v745_v37 = vpop.f32.mrf.mxu1 }
 0x1a3   : > { %v460_v39 = vadd.f32 %v745_v37, %v676_v36  ;;  %v463_v44 = vmax.f32 %v449_v38, 0.0 }
 0x1a4   : > { %v451_v41 = vpop.f32.mrf.mxu1 }
 0x1a5   : > { %v452_v42 = vadd.f32 %v676_v36, %v451_v41  ;;  %v466_v43 = vmax.f32 %v460_v39, 0.0 }
 0x1a7   : > { %v464_v45 = vmax.f32 %v452_v42, 0.0  ;;  %v468_v48 = vpack.c.bf16 %v466_v43, %v465_v46 }
 0x1a9   : > { %v467_v47 = vpack.c.bf16 %v464_v45, %v463_v44 }
 0x1ab   : > { %762 = vmatprep.mubr.bf16.mxu0 %v467_v47 }
 0x1ac   : > { %763 = vmatmul.mubr.bf16.vlgmr.msra.gmra.mxu0 %v468_v48 }
 0x26c   : > { %v764_v49 = vpop.f32.mrf.mxu0 }
 0x26d   : > { %v581_v52 = vadd.f32 %v764_v49, %v685_v50 }
 0x26e   : > { %v572_v51 = vpop.f32.mrf.mxu0 }
 0x26f   : > { %v573_v53 = vadd.f32 %v685_v50, %v572_v51 }
 0x270   : > { %v765_v54 = vpop.f32.mrf.mxu0 }
 0x271   : > { %793 = vtanh.f32 %v573_v53  ;;  %v584_v55 = vadd.f32 %v765_v54, %v685_v50 }
 0x272   : > { %v575_v56 = vpop.f32.mrf.mxu0  ;;  %795 = vtanh.f32 %v581_v52 }
 0x273   : > { %v576_v57 = vadd.f32 %v685_v50, %v575_v56  ;;  %797 = vtanh.f32 %v584_v55 }
 0x275   : > { %799 = vtanh.f32 %v576_v57 }
 0x27e   : > { %v794_v58 = vpop.eup %793 }
 0x27f   : > { %v596_v60 = vmul.f32 %v794_v58, %v694_v59  ;;  %v796_v61 = vpop.eup %795 }
 0x280   : > { %v798_v62 = vpop.eup %797  ;;  %v598_v1 = vmul.f32 %v796_v61, %v694_v59 }
 0x281   : > { %601 = vst.msk [vmem:[%s253_s27] sm:$0xff] %vm600_vm1, %v596_v60  ;;  %v599_v2 = vmul.f32 %v798_v62, %v694_v59 }
 0x282   : > { %v800_v63 = vpop.eup %799  ;;  %603 = vst.msk [vmem:[%s253_s27 + $0x10] sm:$0xff] %vm600_vm1, %v598_v1 }
 0x283   : > { %v597_v0 = vmul.f32 %v800_v63, %v694_v59  ;;  %604 = vst.msk [vmem:[%s253_s27 + $0x18] sm:$0xff] %vm600_vm1, %v599_v2 }
 0x285   : > { %602 = vst.msk [vmem:[%s253_s27 + $0x8] sm:$0xff] %vm600_vm1, %v597_v0 }
 0x286 PF: > { %s16_s21 = sadd.s32 1, %s807_s21  }
 0x287   : > { %p13_p4 = scmp.ge.s32.totalorder %s16_s21, 4  }
 0x289   :  { %15 = sbr.rel (!%p13_p4) target bundleno = 1 (0x1), region = 74 }

</bundles_post_ra>
